<compile_context>
chip_gen: v7x
topology: tpu7x:2x2x1
jax: 0.10.0
libtpu: 0.0.40
codegen_flags: <defaults>
</compile_context>

<pallas_src>
import jax
import jax.numpy as jnp
from jax.experimental import pallas as pl
from jax.experimental.pallas import tpu as pltpu

LN_EPS = 1e-5  # PyTorch nn.LayerNorm default


# --------------------------- tiling / vmem helpers ---------------------------
def _row_tiling(rows, target=512, sublane=8):
    """Pick a row tile and padded row count.

    Returns (tm, padded_rows):
      * rows <= target  -> one block covering everything (block == full dims,
        so the (8,128) divisibility rule does not apply).
      * otherwise       -> tm = target rounded down to a multiple of 8, rows
        padded up to a multiple of tm.
    """
    if rows <= target:
        return rows, rows
    tm = max(sublane, (target // sublane) * sublane)
    padded = ((rows + tm - 1) // tm) * tm
    return tm, padded


def _pad_rows(xf, padded_rows):
    rows = xf.shape[0]
    if padded_rows == rows:
        return xf
    return jnp.pad(xf, ((0, padded_rows - rows), (0, 0)))


def _vmem_limit(block_bytes):
    # Double-buffered blocks + headroom; never below the 32 MiB scoped default,
    # never above 48 MiB (safe on v7x's 64 MiB physical VMEM).
    return int(min(max(32 << 20, 4 * block_bytes + (2 << 20)), 48 << 20))


# ------------------------ fused LayerNorm + Linear kernel --------------------
def _prenorm_linear_kernel(x_ref, g_ref, b_ref, w_ref, bias_ref, o_ref):
    x = x_ref[...].astype(jnp.float32)                        # (TM, D)
    inv_d = 1.0 / x.shape[-1]
    # Single sweep over the tile: row-sum and row-sum-of-squares (independent
    # reductions, no serial mean -> center -> reduce chain).
    mean = jnp.sum(x, axis=-1, keepdims=True) * inv_d
    ex2 = jnp.sum(x * x, axis=-1, keepdims=True) * inv_d
    var = ex2 - mean * mean
    inv = jax.lax.rsqrt(var + LN_EPS)
    y = (x - mean) * inv * g_ref[...].astype(jnp.float32) \
        + b_ref[...].astype(jnp.float32)
    # Feed LN output straight into the MXU; cast to the weight dtype (bf16
    # weights => bf16 MXU inputs on v5e/v6e/v7x), accumulate in f32.
    acc = jnp.dot(y.astype(w_ref.dtype), w_ref[...],
                  preferred_element_type=jnp.float32)
    acc = acc + bias_ref[...].astype(jnp.float32)
    o_ref[...] = acc.astype(o_ref.dtype)


def prenorm_linear(x, gamma, beta, w, b, *, tile_rows=512):
    """Fused: Linear(LayerNorm(x)).  x: (B,S,D), w: (D,Dout), b: (Dout,)."""
    B, S, D = x.shape
    Dout = w.shape[1]
    rows = B * S
    tm, padded = _row_tiling(rows, tile_rows)
    xf = _pad_rows(x.reshape(rows, D), padded)

    block_bytes = 4 * (tm * D + tm * Dout + D * Dout + 2 * D + Dout)
    out = pl.pallas_call(
        _prenorm_linear_kernel,
        out_shape=jax.ShapeDtypeStruct((padded, Dout), x.dtype),
        grid_spec=pl.GridSpec(
            grid=(padded // tm,),
            in_specs=[
                pl.BlockSpec((tm, D), lambda i: (i, 0)),       # x tile
                pl.BlockSpec((1, D), lambda i: (0, 0)),        # gamma (resident)
                pl.BlockSpec((1, D), lambda i: (0, 0)),        # beta  (resident)
                pl.BlockSpec((D, Dout), lambda i: (0, 0)),     # weight (resident)
                pl.BlockSpec((1, Dout), lambda i: (0, 0)),     # bias  (resident)
            ],
            out_specs=pl.BlockSpec((tm, Dout), lambda i: (i, 0)),
        ),
        compiler_params=pltpu.CompilerParams(
            dimension_semantics=("parallel",),
            vmem_limit_bytes=_vmem_limit(block_bytes),
        ),
    )(xf, gamma.reshape(1, D), beta.reshape(1, D), w, b.reshape(1, Dout))
    return out[:rows].reshape(B, S, Dout)


# --------------------------- standalone LayerNorm ----------------------------
def _layernorm_kernel(x_ref, g_ref, b_ref, o_ref):
    x = x_ref[...].astype(jnp.float32)                        # (TM, D)
    inv_d = 1.0 / x.shape[-1]
    mean = jnp.sum(x, axis=-1, keepdims=True) * inv_d
    ex2 = jnp.sum(x * x, axis=-1, keepdims=True) * inv_d
    var = ex2 - mean * mean
    inv = jax.lax.rsqrt(var + LN_EPS)
    y = (x - mean) * inv * g_ref[...].astype(jnp.float32) \
        + b_ref[...].astype(jnp.float32)
    o_ref[...] = y.astype(o_ref.dtype)


def layernorm(x, gamma, beta, *, tile_rows=512):
    B, S, D = x.shape
    rows = B * S
    tm, padded = _row_tiling(rows, tile_rows)
    xf = _pad_rows(x.reshape(rows, D), padded)
    block_bytes = 4 * (2 * tm * D + 2 * D)
    out = pl.pallas_call(
        _layernorm_kernel,
        out_shape=jax.ShapeDtypeStruct((padded, D), x.dtype),
        grid_spec=pl.GridSpec(
            grid=(padded // tm,),
            in_specs=[
                pl.BlockSpec((tm, D), lambda i: (i, 0)),
                pl.BlockSpec((1, D), lambda i: (0, 0)),
                pl.BlockSpec((1, D), lambda i: (0, 0)),
            ],
            out_specs=pl.BlockSpec((tm, D), lambda i: (i, 0)),
        ),
        compiler_params=pltpu.CompilerParams(
            dimension_semantics=("parallel",),
            vmem_limit_bytes=_vmem_limit(block_bytes),
        ),
    )(xf, gamma.reshape(1, D), beta.reshape(1, D))
    return out[:rows].reshape(B, S, D)


# ----------------------------- standalone Linear ------------------------------
def _linear_kernel(x_ref, w_ref, b_ref, o_ref):
    acc = jnp.dot(x_ref[...].astype(w_ref.dtype), w_ref[...],
                  preferred_element_type=jnp.float32)
    acc = acc + b_ref[...].astype(jnp.float32)
    o_ref[...] = acc.astype(o_ref.dtype)


def linear(x, w, b, *, tile_rows=512):
    # TODO(synk): for very large Dout (ViT MLP 4xD at D>~2k) add N/K grid axes
    # + f32 accumulator instead of keeping the full (Din, Dout) weight resident.
    B, S, Din = x.shape
    Dout = w.shape[1]
    rows = B * S
    tm, padded = _row_tiling(rows, tile_rows)
    xf = _pad_rows(x.reshape(rows, Din), padded)
    block_bytes = 4 * (tm * Din + tm * Dout + Din * Dout + Dout)
    out = pl.pallas_call(
        _linear_kernel,
        out_shape=jax.ShapeDtypeStruct((padded, Dout), x.dtype),
        grid_spec=pl.GridSpec(
            grid=(padded // tm,),
            in_specs=[
                pl.BlockSpec((tm, Din), lambda i: (i, 0)),
                pl.BlockSpec((Din, Dout), lambda i: (0, 0)),
                pl.BlockSpec((1, Dout), lambda i: (0, 0)),
            ],
            out_specs=pl.BlockSpec((tm, Dout), lambda i: (i, 0)),
        ),
        compiler_params=pltpu.CompilerParams(
            dimension_semantics=("parallel",),
            vmem_limit_bytes=_vmem_limit(block_bytes),
        ),
    )(xf, w, b.reshape(1, Dout))
    return out[:rows].reshape(B, S, Dout)


# ---------------------------------- PreNorm -----------------------------------
class PallasLinear:
    """Dense layer (D -> Dout) used as the wrapped `fn` in ViT blocks."""

    def __init__(self, w, b):
        self.w = w
        self.b = b

    def __call__(self, x):
        return linear(x, self.w, self.b)


class PreNorm:
    """PreNorm(dim, fn): y = fn(LayerNorm(x), **kwargs).

    When `fn` is a PallasLinear, LayerNorm + Linear are fused into one
    pallas_call (LN output never touches HBM). Otherwise we run the standalone
    LayerNorm kernel and call `fn` on its result (matches the PyTorch module
    for arbitrary wrapped functions)."""

    def __init__(self, dim, fn, *, gamma, beta):
        self.dim = dim
        self.fn = fn
        self.gamma = gamma
        self.beta = beta

    def __call__(self, x, **kwargs):
        if isinstance(self.fn, PallasLinear) and not kwargs:
            return prenorm_linear(x, self.gamma, self.beta, self.fn.w, self.fn.b)
        return self.fn(layernorm(x, self.gamma, self.beta), **kwargs)


# --------------------------------- reference ----------------------------------
def prenorm_ref(x, gamma, beta, w, b):
    xf = x.astype(jnp.float32)
    mean = jnp.mean(xf, axis=-1, keepdims=True)
    var = jnp.mean((xf - mean) ** 2, axis=-1, keepdims=True)
    y = (xf - mean) * jax.lax.rsqrt(var + LN_EPS) * gamma + beta
    return (y @ w + b).astype(x.dtype)


def layernorm_ref(x, gamma, beta):
    xf = x.astype(jnp.float32)
    mean = jnp.mean(xf, axis=-1, keepdims=True)
    var = jnp.mean((xf - mean) ** 2, axis=-1, keepdims=True)
    return ((xf - mean) * jax.lax.rsqrt(var + LN_EPS) * gamma + beta).astype(x.dtype)


if __name__ == "__main__":
    B, S, D = 2, 8, 32
    key = jax.random.PRNGKey(0)
    kx, kg, kb, kw, kbl = jax.random.split(key, 5)

    x = jax.random.normal(kx, (B, S, D), dtype=jnp.float32)
    gamma = 1.0 + 0.1 * jax.random.normal(kg, (D,), dtype=jnp.float32)
    beta = 0.1 * jax.random.normal(kb, (D,), dtype=jnp.float32)
    w = jax.random.normal(kw, (D, D), dtype=jnp.float32) / jnp.sqrt(D)
    bl = 0.1 * jax.random.normal(kbl, (D,), dtype=jnp.float32)

    ref = prenorm_ref(x, gamma, beta, w, bl)

    # Fused path (fn is a dense layer -> single fused kernel).
    module = PreNorm(D, PallasLinear(w, bl), gamma=gamma, beta=beta)
    out = module(x)
    jax.block_until_ready(out)
    assert out.shape == (B, S, D)
    assert jnp.allclose(out, ref, atol=1e-4, rtol=1e-4), "fused mismatch vs reference"

    # Generic path (arbitrary wrapped fn -> standalone LayerNorm kernel + fn).
    module_generic = PreNorm(D, lambda t: linear(t, w, bl), gamma=gamma, beta=beta)
    out2 = module_generic(x)
    jax.block_until_ready(out2)
    assert jnp.allclose(out2, ref, atol=1e-4, rtol=1e-4), "generic mismatch vs reference"

    # Odd row count (exercises the padding path) on the standalone LayerNorm.
    x_odd = jax.random.normal(kx, (1, 5, D), dtype=jnp.float32)
    ln_odd = layernorm(x_odd, gamma, beta)
    jax.block_until_ready(ln_odd)
    assert jnp.allclose(ln_odd, layernorm_ref(x_odd, gamma, beta),
                        atol=1e-4, rtol=1e-4), "layernorm padding-path mismatch"

    print("KERNEL_OK")
</pallas_src>

<mosaic_0001>
module attributes {stable_mosaic.version = 11 : i64} {
  func.func @_prenorm_linear_kernel(%arg0: i32, %arg1: memref<16x32xf32, #tpu.memory_space<vmem>>, %arg2: memref<1x32xf32, #tpu.memory_space<vmem>>, %arg3: memref<1x32xf32, #tpu.memory_space<vmem>>, %arg4: memref<32x32xf32, #tpu.memory_space<vmem>>, %arg5: memref<1x32xf32, #tpu.memory_space<vmem>>, %arg6: memref<16x32xf32, #tpu.memory_space<vmem>>) attributes {dimension_semantics = [#tpu.dimension_semantics<parallel>], iteration_bounds = array<i64: 1>, scalar_prefetch = 0 : i64, scratch_operands = 0 : i64, tpu.core_type = #tpu.core_type<tc>, window_params = [{transform_indices = @transform_0, window_bounds = array<i64: 16, 32>}, {pipeline_mode = #tpu.pipeline_mode<synchronous>, transform_indices = @transform_1, window_bounds = array<i64: 1, 32>}, {pipeline_mode = #tpu.pipeline_mode<synchronous>, transform_indices = @transform_2, window_bounds = array<i64: 1, 32>}, {pipeline_mode = #tpu.pipeline_mode<synchronous>, transform_indices = @transform_3, window_bounds = array<i64: 32, 32>}, {pipeline_mode = #tpu.pipeline_mode<synchronous>, transform_indices = @transform_4, window_bounds = array<i64: 1, 32>}, {transform_indices = @transform_5, window_bounds = array<i64: 16, 32>}]} {
    %c0 = arith.constant 0 : index
    %c0_0 = arith.constant 0 : index
    %0 = vector.load %arg1[%c0, %c0_0] : memref<16x32xf32, #tpu.memory_space<vmem>>, vector<16x32xf32>
    %cst = arith.constant dense<0.000000e+00> : vector<16xf32>
    %1 = vector.multi_reduction <add>, %0, %cst [1] : vector<16x32xf32> to vector<16xf32>
    %2 = vector.shape_cast %1 : vector<16xf32> to vector<16x1xf32>
    %cst_1 = arith.constant 3.125000e-02 : f32
    %3 = vector.broadcast %cst_1 : f32 to vector<16x1xf32>
    %4 = arith.mulf %2, %3 : vector<16x1xf32>
    %5 = arith.mulf %0, %0 : vector<16x32xf32>
    %cst_2 = arith.constant dense<0.000000e+00> : vector<16xf32>
    %6 = vector.multi_reduction <add>, %5, %cst_2 [1] : vector<16x32xf32> to vector<16xf32>
    %7 = vector.shape_cast %6 : vector<16xf32> to vector<16x1xf32>
    %cst_3 = arith.constant 3.125000e-02 : f32
    %8 = vector.broadcast %cst_3 : f32 to vector<16x1xf32>
    %9 = arith.mulf %7, %8 : vector<16x1xf32>
    %10 = arith.mulf %4, %4 : vector<16x1xf32>
    %11 = arith.subf %9, %10 : vector<16x1xf32>
    %cst_4 = arith.constant 9.99999974E-6 : f32
    %12 = vector.broadcast %cst_4 : f32 to vector<16x1xf32>
    %13 = arith.addf %11, %12 : vector<16x1xf32>
    %14 = math.rsqrt %13 : vector<16x1xf32>
    %15 = vector.broadcast %4 : vector<16x1xf32> to vector<16x32xf32>
    %16 = arith.subf %0, %15 : vector<16x32xf32>
    %17 = vector.broadcast %14 : vector<16x1xf32> to vector<16x32xf32>
    %18 = arith.mulf %16, %17 : vector<16x32xf32>
    %c0_5 = arith.constant 0 : index
    %c0_6 = arith.constant 0 : index
    %19 = vector.load %arg2[%c0_5, %c0_6] : memref<1x32xf32, #tpu.memory_space<vmem>>, vector<1x32xf32>
    %20 = vector.broadcast %19 : vector<1x32xf32> to vector<16x32xf32>
    %21 = arith.mulf %18, %20 : vector<16x32xf32>
    %c0_7 = arith.constant 0 : index
    %c0_8 = arith.constant 0 : index
    %22 = vector.load %arg3[%c0_7, %c0_8] : memref<1x32xf32, #tpu.memory_space<vmem>>, vector<1x32xf32>
    %23 = vector.broadcast %22 : vector<1x32xf32> to vector<16x32xf32>
    %24 = arith.addf %21, %23 : vector<16x32xf32>
    %c0_9 = arith.constant 0 : index
    %c0_10 = arith.constant 0 : index
    %25 = vector.load %arg4[%c0_9, %c0_10] : memref<32x32xf32, #tpu.memory_space<vmem>>, vector<32x32xf32>
    %cst_11 = arith.constant dense<0.000000e+00> : vector<16x32xf32>
    %26 = tpu.matmul %24, %25, %cst_11 {dimension_numbers = #tpu.dot_dimension_numbers<[1], [0], [0], [1], [0, 0, 1, 1], [], []>} : vector<16x32xf32>, vector<32x32xf32>, vector<16x32xf32> -> vector<16x32xf32>
    %c0_12 = arith.constant 0 : index
    %c0_13 = arith.constant 0 : index
    %27 = vector.load %arg5[%c0_12, %c0_13] : memref<1x32xf32, #tpu.memory_space<vmem>>, vector<1x32xf32>
    %28 = vector.broadcast %27 : vector<1x32xf32> to vector<16x32xf32>
    %29 = arith.addf %26, %28 : vector<16x32xf32>
    %c0_14 = arith.constant 0 : index
    %c0_15 = arith.constant 0 : index
    %30 = vector.load %arg6[%c0_14, %c0_15] : memref<16x32xf32, #tpu.memory_space<vmem>>, vector<16x32xf32>
    tpu.vector_store %arg6[%c0_14, %c0_15], %29 {strides = array<i32>} : memref<16x32xf32, #tpu.memory_space<vmem>>, vector<16x32xf32>,
    return
  }
  func.func @transform_0(%arg0: i32) -> (i32, i32) {
    %c0_i32 = arith.constant 0 : i32
    %c0_i32_0 = arith.constant 0 : i32
    return %arg0, %c0_i32 : i32, i32
  }
  func.func @transform_1(%arg0: i32) -> (i32, i32) {
    %c0_i32 = arith.constant 0 : i32
    %c0_i32_0 = arith.constant 0 : i32
    %c0_i32_1 = arith.constant 0 : i32
    return %c0_i32, %c0_i32_0 : i32, i32
  }
  func.func @transform_2(%arg0: i32) -> (i32, i32) {
    %c0_i32 = arith.constant 0 : i32
    %c0_i32_0 = arith.constant 0 : i32
    %c0_i32_1 = arith.constant 0 : i32
    return %c0_i32, %c0_i32_0 : i32, i32
  }
  func.func @transform_3(%arg0: i32) -> (i32, i32) {
    %c0_i32 = arith.constant 0 : i32
    %c0_i32_0 = arith.constant 0 : i32
    %c0_i32_1 = arith.constant 0 : i32
    return %c0_i32, %c0_i32_0 : i32, i32
  }
  func.func @transform_4(%arg0: i32) -> (i32, i32) {
    %c0_i32 = arith.constant 0 : i32
    %c0_i32_0 = arith.constant 0 : i32
    %c0_i32_1 = arith.constant 0 : i32
    return %c0_i32, %c0_i32_0 : i32, i32
  }
  func.func @transform_5(%arg0: i32) -> (i32, i32) {
    %c0_i32 = arith.constant 0 : i32
    %c0_i32_0 = arith.constant 0 : i32
    return %arg0, %c0_i32 : i32, i32
  }
}

</mosaic_0001>

<bundles_post_ra>
// kernel: tpu_custom_call.1
= control target key start
LH: loop header
LB: loop body
LE: loop exit
PB: predicated region body
PF: predicated region fallthrough
CT: control target
= control target key end

     0   :  { %10 = vsyncpa [#allocation3], 0  ;;  %s420_s0 = inlined_call_operand.hbm [shape: f32[16,32], index: 0, kind: input, shape index: {}]   ;;  %s421_s1 = inlined_call_operand.vmem [shape: f32[1,32], index: 1, kind: input, shape index: {}]   ;;  %s422_s2 = inlined_call_operand.vmem [shape: f32[1,32], index: 2, kind: input, shape index: {}]   ;;  %s423_s3 = inlined_call_operand.hbm [shape: f32[32,32], index: 3, kind: input, shape index: {}]   ;;  %s424_s4 = inlined_call_operand.vmem [shape: f32[1,32], index: 4, kind: input, shape index: {}]   ;;  %s425_s5 = inlined_call_operand.hbm [shape: f32[16,32], index: 5, kind: output, shape index: {}]  }
   0x1   :  { %11 = vsyncpa [#allocation6], 0 }
   0x2   :  { %12 = vsyncpa [#allocation4], 0  ;;  %s323_s18 = smov [#allocation2]   ;;  %s251_s22 = scalar_lea.hbm %s420_s0, 256 }
   0x3   :  { %s18_s19 = sshll.u32 %s323_s18, 4  ;;  %p252_p0 = scmp.ne.s32.totalorder %s420_s0, %s251_s22  ;;  %s19_s19 = int_to_ptr.vmem [resolvable:$true] %s18_s19 }
   0x4   :  { %p255_p1 = scmp.lt.u32.totalorder %s251_s22, %s420_s0 }
   0x6   :  { %p257_p2 = pnand %p255_p1, %p252_p0 }
   0x8   :  { %260 = shalt.err (!%p257_p2)
}
   0x9   :  { %s261_s27 = scalar_lea.vmem %s19_s19, 256  ;;  %p266_p4 = scmp.lt.s32.totalorder %s19_s19, %s19_s19 }
   0xa   :  { %p262_p3 = scmp.ne.s32.totalorder %s19_s19, %s261_s27  ;;  %p267_p5 = scmp.lt.s32.totalorder %s261_s27, %s261_s27 }
   0xc   :  { %p268_p6 = por %p267_p5, %p266_p4 }
   0xe   :  { %p269_p7 = pnand %p268_p6, %p262_p3 }
  0x10   :  { %272 = shalt.err (!%p269_p7)
}
  0x11   :  { %s324_s28 = smov 128   ;;  %s325_s29 = smov 8  }
  0x12   :  { %24 = dma.hbm_to_vmem [thread:$0]  %s420_s0, 256, %s19_s19, [#allocation3], %s324_s28, %s324_s28, %s325_s29  }
  0x13   :  { %s326_s7 = smov [#allocation5]   ;;  %s273_s11 = scalar_lea.hbm %s423_s3, 512 }
  0x14   :  { %s34_s8 = sshll.u32 %s326_s7, 4  ;;  %p274_p8 = scmp.ne.s32.totalorder %s423_s3, %s273_s11  ;;  %s35_s8 = int_to_ptr.vmem [resolvable:$true] %s34_s8 }
  0x15   :  { %p277_p9 = scmp.lt.u32.totalorder %s273_s11, %s423_s3 }
  0x17   :  { %p279_p10 = pnand %p277_p9, %p274_p8 }
  0x19   :  { %282 = shalt.err (!%p279_p10)
}
  0x1a   :  { %s283_s16 = scalar_lea.vmem %s35_s8, 512  ;;  %p288_p12 = scmp.lt.s32.totalorder %s35_s8, %s35_s8 }
  0x1b   :  { %p284_p11 = scmp.ne.s32.totalorder %s35_s8, %s283_s16  ;;  %p289_p13 = scmp.lt.s32.totalorder %s283_s16, %s283_s16 }
  0x1d   :  { %p290_p0 = por %p289_p13, %p288_p12 }
  0x1f   :  { %p291_p1 = pnand %p290_p0, %p284_p11 }
  0x21   :  { %294 = shalt.err (!%p291_p1)
}
  0x22   :  { %40 = dma.hbm_to_vmem [thread:$0]  %s423_s3, 512, %s35_s8, [#allocation6], %s324_s28, %s324_s28, %s325_s29  }
  0x23   :  { %317 = dma.done.wait [#allocation3], 256  }
  0x24   :  { %318 = vsyncadd [#allocation3], 4294967040 }
  0x25   :  { %319 = dma.done.wait [#allocation6], 512  }
  0x26   :  { %320 = vsyncadd [#allocation6], 4294966784  ;;  %vm51_vm0 = vcmask 261120   ;;  %v49_v0 = vld [vmem:[#allocation2] sm:$0xff]  ;;  %v50_v1 = vld [vmem:[#allocation2 + $0x8] sm:$0xff] }
  0x27   :  { %v52_v2 = vsel %vm51_vm0, %v49_v0, 0.0  ;;  %v60_v3 = vmul.f32 %v49_v0, %v49_v0  ;;  %v61_v4 = vmul.f32 %v50_v1, %v50_v1  ;;  %v55_v6 = vsel %vm51_vm0, %v50_v1, 0.0  ;;  %v100_v8 = vld [vmem:[#allocation5] sm:$0xff]  ;;  %v101_v9 = vld [vmem:[#allocation5 + $0x8] sm:$0xff]  ;;  %v102_v10 = vld [vmem:[#allocation5 + $0x10] sm:$0xff] }
  0x28   :  { %53 = vadd.xlane.f32.xlu0 %v52_v2  ;;  %v234_v11 = vpack.c.bf16 %v101_v9, %v100_v8  ;;  %v103_v12 = vld [vmem:[#allocation5 + $0x18] sm:$0xff]  ;;  %v212_v30 = vld [vmem:[%s421_s1] ss:$0 sm:$0xff]  ;;  %s327_s1 = smov [#allocation7]  }
  0x29   :  { %v62_v5 = vsel %vm51_vm0, %v60_v3, 0.0  ;;  %v65_v7 = vsel %vm51_vm0, %v61_v4, 0.0  ;;  %v238_v13 = vpack.c.bf16 %v103_v12, %v102_v10  ;;  %v213_v32 = vld [vmem:[%s422_s2] ss:$0 sm:$0xff]  ;;  %s199_s23 = sshll.u32 %s327_s1, 4  ;;  %s200_s23 = int_to_ptr.vmem [resolvable:$true] %s199_s23 }
  0x2a   :  { %63 = vadd.xlane.f32.xlu1 %v62_v5  ;;  %235 = vmatprep.subr.bf16.mxu0 %v234_v11  ;;  %v214_v40 = vld [vmem:[%s424_s4] ss:$0 sm:$0xff]  ;;  %s295_s2 = scalar_lea.vmem %s200_s23, 256  ;;  %p300_p3 = scmp.lt.s32.totalorder %s200_s23, %s200_s23 }
  0x2b   :  { %237 = vmatpush3.bf16.msra.mxu0 %v234_v11  ;;  %p296_p2 = scmp.ne.s32.totalorder %s200_s23, %s295_s2  ;;  %p301_p4 = scmp.lt.s32.totalorder %s295_s2, %s295_s2 }
  0x2c   :  { %56 = vadd.xlane.f32.xlu0 %v55_v6  ;;  %239 = vmatprep.subr.bf16.mxu0 %v238_v13 }
  0x2d   :  { %p302_p5 = por %p301_p4, %p300_p3 }
  0x2e   :  { %66 = vadd.xlane.f32.xlu1 %v65_v7 }
  0x2f   :  { %241 = vmatpush3.bf16.msra.mxu0 %v238_v13  ;;  %p303_p6 = pnand %p302_p5, %p296_p2 }
  0xb5   :  { %v54_v14 = vpop.xlane.xlu0 %53 }
  0xb6   :  { %v58_v15 = vmul.f32 0.03125, %v54_v14 }
  0xb7   :  { %v64_v16 = vpop.xlane.xlu1 %63 }
  0xb8   :  { %v70_v17 = vmul.f32 %v58_v15, %v58_v15  ;;  %v68_v18 = vmul.f32 0.03125, %v64_v16  ;;  %v78_v28 = vsub.f32 %v49_v0, %v58_v15 }
  0xb9   :  { %v57_v19 = vpop.xlane.xlu0 %56 }
  0xba   :  { %v72_v20 = vsub.f32 %v68_v18, %v70_v17  ;;  %v59_v21 = vmul.f32 0.03125, %v57_v19 }
  0xbb   :  { %v67_v22 = vpop.xlane.xlu1 %66 }
  0xbc   :  { %v74_v23 = vadd.f32 1e-05, %v72_v20  ;;  %v71_v24 = vmul.f32 %v59_v21, %v59_v21  ;;  %v69_v25 = vmul.f32 0.03125, %v67_v22  ;;  %v79_v33 = vsub.f32 %v50_v1, %v59_v21 }
  0xbe   :  { %247 = vrsqrt.f32 %v74_v23  ;;  %v73_v26 = vsub.f32 %v69_v25, %v71_v24 }
  0xc0   :  { %v75_v27 = vadd.f32 1e-05, %v73_v26 }
  0xc2   :  { %249 = vrsqrt.f32 %v75_v27 }
  0xc8   :  { %v248_v29 = vpop.eup %247 }
  0xc9   :  { %v80_v31 = vmul.f32 %v248_v29, %v78_v28 }
  0xcb   :  { %v89_v34 = vmul.f32 %v212_v30, %v80_v31 }
  0xcc   :  { %v250_v35 = vpop.eup %249 }
  0xcd   :  { %v81_v36 = vmul.f32 %v250_v35, %v79_v33  ;;  %v98_v37 = vadd.f32 %v213_v32, %v89_v34 }
  0xcf   :  { %v90_v38 = vmul.f32 %v212_v30, %v81_v36  ;;  %231 = vmatprep.mubr.msk.f32.mxu0 %vm51_vm0, %v98_v37 }
  0xd1   :  { %v99_v39 = vadd.f32 %v213_v32, %v90_v38 }
  0xd3   :  { %232 = vmatmul.mubr.msk.f32.vlgmr.msra.gmra.mrb[0].mxu0 %vm51_vm0, %v99_v39 }
 0x1a6   :  { %v233_v41 = vpop.f32.mrb[0].mxu0 }
 0x1a7   :  { %v189_v42 = vadd.f32 %v233_v41, %v214_v40  ;;  %v183_v43 = vpop.f32.mrb[1].mxu0 }
 0x1a8   :  { %v184_v44 = vadd.f32 %v214_v40, %v183_v43 }
 0x1a9   :  { %193 = vst.msk [vmem:[#allocation7 + $0x8] sm:$0xff] %vm51_vm0, %v189_v42 }
 0x1aa   :  { %192 = vst.msk [vmem:[#allocation7] sm:$0xff] %vm51_vm0, %v184_v44 }
 0x1ab   :  { %306 = shalt.err (!%p303_p6)
}
 0x1ac   :  { %s307_s25 = scalar_lea.hbm %s425_s5, 256 }
 0x1ad   :  { %p308_p7 = scmp.ne.s32.totalorder %s425_s5, %s307_s25  ;;  %p311_p8 = scmp.lt.u32.totalorder %s307_s25, %s425_s5 }
 0x1af   :  { %p313_p9 = pnand %p311_p8, %p308_p7 }
 0x1b1   :  { %316 = shalt.err (!%p313_p9)
}
 0x1b2   :  { %205 = dma.vmem_to_hbm [thread:$0]  %s200_s23, 256, %s425_s5, [#allocation4], %s324_s28, %s324_s28, %s325_s29  }
 0x1b3   :  { %321 = dma.done.wait [#allocation4], 256  }
 0x1b4   :  { %322 = vsyncadd [#allocation4], 4294967040 }
 0x1b5   :  { %209 = vsyncpa [#allocation3], 1 }
 0x1b6   :  { %210 = vsyncpa [#allocation6], 1 }
 0x1b7   :  { %211 = vsyncpa [#allocation4], 1 }

</bundles_post_ra>
